<compile_context>
chip_gen: v7x
topology: tpu7x:2x2x1
jax: 0.10.0
libtpu: 0.0.40
codegen_flags: <defaults>
</compile_context>

<pallas_src>
import functools
import math

import jax
import jax.numpy as jnp
from jax.experimental import pallas as pl
from jax.experimental.pallas import tpu as pltpu


def _bce_kernel(n_rows, inner_steps, tile_rows, logits_ref, labels_ref, out_ref):
    p = pl.program_id(0)   # TensorCore split (leading axis)
    i = pl.program_id(1)   # reduction steps within this split

    # The (8, L) output block is resident across the inner reduction axis:
    # zero it on the first step of each split, accumulate afterwards.
    @pl.when(i == 0)
    def _():
        out_ref[...] = jnp.zeros_like(out_ref)

    x = logits_ref[...].astype(jnp.float32)
    y = labels_ref[...].astype(jnp.float32)
    lanes = x.shape[1]

    block_raw = p * inner_steps + i          # unclamped block index
    row0 = block_raw * tile_rows
    # True only for the final partial block or a clamped duplicate block
    # produced by the core split; interior blocks take the lean path.
    is_edge = row0 + tile_rows > n_rows

    @pl.when(jnp.logical_not(is_edge))
    def _():
        # Steady-state path: pure VPU/EUP math, no iota / compare / select.
        elem = jnp.maximum(x, 0.0) - x * y + jnp.log1p(jnp.exp(-jnp.abs(x)))
        # Leading-axis reshape is tile-aligned (groups of 8 sublanes); the
        # fold into the (8, L) accumulator stays on the VPU.
        out_ref[...] += elem.reshape(tile_rows // 8, 8, lanes).sum(axis=0)

    @pl.when(is_edge)
    def _():
        # Rare path: mask rows past the real array (partial block) and
        # everything in a duplicate block.  Mask x/y before the
        # transcendentals so edge-block garbage can never produce NaN/Inf.
        row = row0 + jax.lax.broadcasted_iota(jnp.int32, x.shape, 0)
        valid = row < n_rows
        xm = jnp.where(valid, x, 0.0)
        ym = jnp.where(valid, y, 0.0)
        elem = jnp.maximum(xm, 0.0) - xm * ym + jnp.log1p(jnp.exp(-jnp.abs(xm)))
        elem = jnp.where(valid, elem, 0.0)
        out_ref[...] += elem.reshape(tile_rows // 8, 8, lanes).sum(axis=0)


def _num_tensorcores():
    """Best-effort TensorCore count; defaults to 1 (correct for v5e/v6e)."""
    try:
        info = pltpu.get_tpu_info()
    except Exception:
        return 1
    for name in ("num_cores", "num_tensorcores", "tensorcore_count",
                 "core_count", "cores_per_chip"):
        n = getattr(info, name, None)
        if isinstance(n, int) and n > 1:
            return n
    return 1


def bce_with_logits_loss(logits, labels, *,
                         lane_width=512,
                         target_tile_bytes=2 * 1024 * 1024,
                         num_splits=None):
    """Mean BCE-with-logits over all elements, computed in a Pallas kernel."""
    assert logits.shape == labels.shape
    total = math.prod(logits.shape)
    itemsize = jnp.dtype(logits.dtype).itemsize

    # Fast path: input is already a lane-dense 2D slab and an 8-row tile fits
    # the byte budget -> use it directly (no extra HBM pass).
    direct = (logits.ndim == 2
              and logits.shape[1] % 128 == 0
              and logits.shape[1] * itemsize * 8 <= target_tile_bytes)
    if direct:
        slab_x, slab_y = logits, labels
    else:
        # Flatten to a lane-dense (R, lane_width) slab.  Pad with a sentinel
        # whose BCE term is exactly 0: logit=-1e4 (exp underflows), label=0.
        flat_x = logits.reshape(-1)
        flat_y = labels.reshape(-1)
        pad = (-total) % lane_width
        if pad:
            flat_x = jnp.pad(flat_x, (0, pad), constant_values=-1e4)
            flat_y = jnp.pad(flat_y, (0, pad), constant_values=0)
        slab_x = flat_x.reshape(-1, lane_width)
        slab_y = flat_y.reshape(-1, lane_width)

    R, L = slab_x.shape
    x_itemsize = jnp.dtype(slab_x.dtype).itemsize
    y_itemsize = jnp.dtype(slab_y.dtype).itemsize

    # Row tile sized by a byte budget, multiple of 8 sublanes, capped at the
    # 8-padded row count.
    padded_rows = pl.cdiv(R, 8) * 8
    tile_rows = max(8, (target_tile_bytes // max(1, x_itemsize * L)) // 8 * 8)
    tile_rows = int(min(tile_rows, padded_rows))

    num_blocks = pl.cdiv(R, tile_rows)
    if num_splits is None:
        num_splits = _num_tensorcores()
    num_splits = max(1, min(int(num_splits), num_blocks))
    inner_steps = pl.cdiv(num_blocks, num_splits)
    grid = (num_splits, inner_steps)
    last_block = num_blocks - 1

    # Clamp the block index so every DMA stays inside the array; the gated
    # in-kernel mask zeroes any duplicated / padded contribution.
    def in_map(p, i):
        return (jnp.minimum(p * inner_steps + i, last_block), 0)

    kernel = functools.partial(_bce_kernel, R, inner_steps, tile_rows)

    cost = pl.CostEstimate(
        flops=6 * R * L,
        transcendentals=2 * R * L,
        bytes_accessed=R * L * (x_itemsize + y_itemsize) + num_splits * 8 * L * 4,
    )

    if num_splits > 1:
        semantics = ("parallel", "arbitrary")
    else:
        semantics = ("arbitrary", "arbitrary")

    partials = pl.pallas_call(
        kernel,
        out_shape=jax.ShapeDtypeStruct((num_splits * 8, L), jnp.float32),
        grid_spec=pltpu.PrefetchScalarGridSpec(
            num_scalar_prefetch=0,
            grid=grid,
            in_specs=[
                pl.BlockSpec((tile_rows, L), in_map),
                pl.BlockSpec((tile_rows, L), in_map),
            ],
            # One resident lane-dense (8, L) partial-sum block per split.
            out_specs=pl.BlockSpec((8, L), lambda p, i: (p, 0)),
        ),
        compiler_params=pltpu.CompilerParams(
            dimension_semantics=semantics,
            vmem_limit_bytes=32 * 1024 * 1024,
        ),
        cost_estimate=cost,
    )(slab_x, slab_y)

    # Single cheap cross-lane reduction + mean outside the kernel.
    return jnp.sum(partials) / jnp.float32(total)


def teacher_loss_forward(logits, labels, inputs=None, graph=None,
                         middle_feats_s=None, target=None,
                         loss_weight=None, t_model=None):
    """Pallas equivalent of TeacherLoss.forward: returns (loss, [0])."""
    # TODO(synk): inputs/graph/middle_feats_s/target/loss_weight/t_model are
    # unused by the reference module's forward and are ignored here.
    loss = bce_with_logits_loss(logits, labels)
    return loss, jnp.array([0], dtype=jnp.int32)


def _bce_ref(logits, labels):
    x = logits.astype(jnp.float32)
    y = labels.astype(jnp.float32)
    return jnp.mean(jnp.maximum(x, 0.0) - x * y + jnp.log1p(jnp.exp(-jnp.abs(x))))


if __name__ == "__main__":
    key = jax.random.PRNGKey(0)
    k1, k2, k3, k4, k5, k6 = jax.random.split(key, 6)

    # 1) Lane-dense direct path: 32 "examples" x 128 classes.
    N, C = 32, 128
    logits = jax.random.normal(k1, (N, C), dtype=jnp.float32)
    labels = (jax.random.uniform(k2, (N, C)) > 0.5).astype(jnp.float32)
    loss, aux = teacher_loss_forward(logits, labels)
    loss = jax.block_until_ready(loss)
    ref = _bce_ref(logits, labels)
    assert jnp.allclose(loss, ref, rtol=1e-5, atol=1e-6), (loss, ref)
    assert int(aux[0]) == 0

    # 2) Direct path with a partial (masked) last block: rows not % 8.
    N2, C2 = 100, 128
    logits2 = jax.random.normal(k3, (N2, C2), dtype=jnp.float32)
    labels2 = (jax.random.uniform(k4, (N2, C2)) > 0.5).astype(jnp.float32)
    loss2, _ = teacher_loss_forward(logits2, labels2)
    loss2 = jax.block_until_ready(loss2)
    ref2 = _bce_ref(logits2, labels2)
    assert jnp.allclose(loss2, ref2, rtol=1e-5, atol=1e-6), (loss2, ref2)

    # 3) Non-lane-dense shape -> flatten/pad path (sentinel padding).
    N3, C3 = 6, 50
    logits3 = jax.random.normal(k5, (N3, C3), dtype=jnp.float32)
    labels3 = (jax.random.uniform(k6, (N3, C3)) > 0.5).astype(jnp.float32)
    loss3, _ = teacher_loss_forward(logits3, labels3)
    loss3 = jax.block_until_ready(loss3)
    ref3 = _bce_ref(logits3, labels3)
    assert jnp.allclose(loss3, ref3, rtol=1e-5, atol=1e-6), (loss3, ref3)

    print("KERNEL_OK")
</pallas_src>

<mosaic_0001>
module attributes {stable_mosaic.version = 11 : i64} {
  func.func @_bce_kernel(%arg0: i32, %arg1: i32, %arg2: memref<32x128xf32, #tpu.memory_space<vmem>>, %arg3: memref<32x128xf32, #tpu.memory_space<vmem>>, %arg4: memref<8x128xf32, #tpu.memory_space<vmem>>) attributes {dimension_semantics = [#tpu.dimension_semantics<arbitrary>, #tpu.dimension_semantics<arbitrary>], iteration_bounds = array<i64: 1, 1>, scalar_prefetch = 0 : i64, scratch_operands = 0 : i64, tpu.core_type = #tpu.core_type<tc>, window_params = [{transform_indices = @transform_0, window_bounds = array<i64: 32, 128>}, {transform_indices = @transform_1, window_bounds = array<i64: 32, 128>}, {transform_indices = @transform_2, window_bounds = array<i64: 8, 128>}]} {
    %c0_i32 = arith.constant 0 : i32
    %0 = arith.cmpi eq, %arg1, %c0_i32 : i32
    %1 = arith.extui %0 : i1 to i32
    %c0_i32_0 = arith.constant 0 : i32
    %2 = arith.cmpi ne, %1, %c0_i32_0 : i32
    scf.if %2 {
      %cst = arith.constant 0.000000e+00 : f32
      %15 = vector.broadcast %cst : f32 to vector<8x128xf32>
      %c0_8 = arith.constant 0 : index
      %c0_9 = arith.constant 0 : index
      %16 = vector.load %arg4[%c0_8, %c0_9] : memref<8x128xf32, #tpu.memory_space<vmem>>, vector<8x128xf32>
      tpu.vector_store %arg4[%c0_8, %c0_9], %15 {strides = array<i32>} : memref<8x128xf32, #tpu.memory_space<vmem>>, vector<8x128xf32>,
    } else {
    }
    %c0 = arith.constant 0 : index
    %c0_1 = arith.constant 0 : index
    %3 = vector.load %arg2[%c0, %c0_1] : memref<32x128xf32, #tpu.memory_space<vmem>>, vector<32x128xf32>
    %c0_2 = arith.constant 0 : index
    %c0_3 = arith.constant 0 : index
    %4 = vector.load %arg3[%c0_2, %c0_3] : memref<32x128xf32, #tpu.memory_space<vmem>>, vector<32x128xf32>
    %c1_i32 = arith.constant 1 : i32
    %5 = arith.muli %arg0, %c1_i32 : i32
    %6 = arith.addi %5, %arg1 : i32
    %c32_i32 = arith.constant 32 : i32
    %7 = arith.muli %6, %c32_i32 : i32
    %c32_i32_4 = arith.constant 32 : i32
    %8 = arith.addi %7, %c32_i32_4 : i32
    %c32_i32_5 = arith.constant 32 : i32
    %9 = arith.cmpi sgt, %8, %c32_i32_5 : i32
    %true = arith.constant true
    %10 = arith.xori %9, %true : i1
    %11 = arith.extui %10 : i1 to i32
    %c0_i32_6 = arith.constant 0 : i32
    %12 = arith.cmpi ne, %11, %c0_i32_6 : i32
    scf.if %12 {
      %cst = arith.constant 0.000000e+00 : f32
      %15 = vector.broadcast %cst : f32 to vector<32x128xf32>
      %16 = arith.maximumf %3, %15 : vector<32x128xf32>
      %17 = arith.mulf %3, %4 : vector<32x128xf32>
      %18 = arith.subf %16, %17 : vector<32x128xf32>
      %19 = math.absf %3 : vector<32x128xf32>
      %cst_8 = arith.constant 0.000000e+00 : f32
      %20 = vector.broadcast %cst_8 : f32 to vector<32x128xf32>
      %21 = arith.subf %20, %19 : vector<32x128xf32>
      %22 = math.exp %21 : vector<32x128xf32>
      %23 = math.log1p %22 : vector<32x128xf32>
      %24 = arith.addf %18, %23 : vector<32x128xf32>
      %c0_9 = arith.constant 0 : index
      %c0_10 = arith.constant 0 : index
      %25 = vector.load %arg4[%c0_9, %c0_10] : memref<8x128xf32, #tpu.memory_space<vmem>>, vector<8x128xf32>
      %26 = vector.shape_cast %24 : vector<32x128xf32> to vector<4x8x128xf32>
      %cst_11 = arith.constant dense<0.000000e+00> : vector<8x128xf32>
      %27 = vector.multi_reduction <add>, %26, %cst_11 [0] : vector<4x8x128xf32> to vector<8x128xf32>
      %28 = arith.addf %25, %27 : vector<8x128xf32>
      %c0_12 = arith.constant 0 : index
      %c0_13 = arith.constant 0 : index
      %29 = vector.load %arg4[%c0_12, %c0_13] : memref<8x128xf32, #tpu.memory_space<vmem>>, vector<8x128xf32>
      tpu.vector_store %arg4[%c0_12, %c0_13], %28 {strides = array<i32>} : memref<8x128xf32, #tpu.memory_space<vmem>>, vector<8x128xf32>,
    } else {
    }
    %13 = arith.extui %9 : i1 to i32
    %c0_i32_7 = arith.constant 0 : i32
    %14 = arith.cmpi ne, %13, %c0_i32_7 : i32
    scf.if %14 {
      %15 = tpu.iota {dimensions = array<i32: 0>} : vector<32x128xi32>
      %16 = vector.broadcast %7 : i32 to vector<32x128xi32>
      %17 = arith.addi %16, %15 : vector<32x128xi32>
      %c32_i32_8 = arith.constant 32 : i32
      %18 = vector.broadcast %c32_i32_8 : i32 to vector<32x128xi32>
      %19 = arith.cmpi slt, %17, %18 : vector<32x128xi32>
      %cst = arith.constant 0.000000e+00 : f32
      %20 = vector.broadcast %cst : f32 to vector<32x128xf32>
      %21 = arith.select %19, %3, %20 : vector<32x128xi1>, vector<32x128xf32>
      %cst_9 = arith.constant 0.000000e+00 : f32
      %22 = vector.broadcast %cst_9 : f32 to vector<32x128xf32>
      %23 = arith.select %19, %4, %22 : vector<32x128xi1>, vector<32x128xf32>
      %cst_10 = arith.constant 0.000000e+00 : f32
      %24 = vector.broadcast %cst_10 : f32 to vector<32x128xf32>
      %25 = arith.maximumf %21, %24 : vector<32x128xf32>
      %26 = arith.mulf %21, %23 : vector<32x128xf32>
      %27 = arith.subf %25, %26 : vector<32x128xf32>
      %28 = math.absf %21 : vector<32x128xf32>
      %cst_11 = arith.constant 0.000000e+00 : f32
      %29 = vector.broadcast %cst_11 : f32 to vector<32x128xf32>
      %30 = arith.subf %29, %28 : vector<32x128xf32>
      %31 = math.exp %30 : vector<32x128xf32>
      %32 = math.log1p %31 : vector<32x128xf32>
      %33 = arith.addf %27, %32 : vector<32x128xf32>
      %cst_12 = arith.constant 0.000000e+00 : f32
      %34 = vector.broadcast %cst_12 : f32 to vector<32x128xf32>
      %35 = arith.select %19, %33, %34 : vector<32x128xi1>, vector<32x128xf32>
      %c0_13 = arith.constant 0 : index
      %c0_14 = arith.constant 0 : index
      %36 = vector.load %arg4[%c0_13, %c0_14] : memref<8x128xf32, #tpu.memory_space<vmem>>, vector<8x128xf32>
      %37 = vector.shape_cast %35 : vector<32x128xf32> to vector<4x8x128xf32>
      %cst_15 = arith.constant dense<0.000000e+00> : vector<8x128xf32>
      %38 = vector.multi_reduction <add>, %37, %cst_15 [0] : vector<4x8x128xf32> to vector<8x128xf32>
      %39 = arith.addf %36, %38 : vector<8x128xf32>
      %c0_16 = arith.constant 0 : index
      %c0_17 = arith.constant 0 : index
      %40 = vector.load %arg4[%c0_16, %c0_17] : memref<8x128xf32, #tpu.memory_space<vmem>>, vector<8x128xf32>
      tpu.vector_store %arg4[%c0_16, %c0_17], %39 {strides = array<i32>} : memref<8x128xf32, #tpu.memory_space<vmem>>, vector<8x128xf32>,
    } else {
    }
    return
  }
  func.func @transform_0(%arg0: i32, %arg1: i32) -> (i32, i32) {
    %c1_i32 = arith.constant 1 : i32
    %0 = arith.muli %arg0, %c1_i32 : i32
    %1 = arith.addi %0, %arg1 : i32
    %c0_i32 = arith.constant 0 : i32
    %2 = arith.minsi %1, %c0_i32 : i32
    %c0_i32_0 = arith.constant 0 : i32
    %c0_i32_1 = arith.constant 0 : i32
    return %2, %c0_i32_0 : i32, i32
  }
  func.func @transform_1(%arg0: i32, %arg1: i32) -> (i32, i32) {
    %c1_i32 = arith.constant 1 : i32
    %0 = arith.muli %arg0, %c1_i32 : i32
    %1 = arith.addi %0, %arg1 : i32
    %c0_i32 = arith.constant 0 : i32
    %2 = arith.minsi %1, %c0_i32 : i32
    %c0_i32_0 = arith.constant 0 : i32
    %c0_i32_1 = arith.constant 0 : i32
    return %2, %c0_i32_0 : i32, i32
  }
  func.func @transform_2(%arg0: i32, %arg1: i32) -> (i32, i32) {
    %c0_i32 = arith.constant 0 : i32
    %c0_i32_0 = arith.constant 0 : i32
    return %arg0, %c0_i32 : i32, i32
  }
}

</mosaic_0001>

<bundles_post_ra>
// kernel: tpu_custom_call.1
= control target key start
LH: loop header
LB: loop body
LE: loop exit
PB: predicated region body
PF: predicated region fallthrough
CT: control target
= control target key end

     0   :  { %7 = vsyncpa [#allocation3], 0  ;;  %s450_s0 = inlined_call_operand.hbm [shape: f32[32,128], index: 0, kind: input, shape index: {}]   ;;  %s451_s1 = inlined_call_operand.hbm [shape: f32[32,128], index: 1, kind: input, shape index: {}]   ;;  %s452_s2 = inlined_call_operand.hbm [shape: f32[8,128], index: 2, kind: output, shape index: {}]  }
   0x1   :  { %8 = vsyncpa [#allocation6], 0 }
   0x2   :  { %9 = vsyncpa [#allocation4], 0  ;;  %s372_s9 = smov [#allocation2]   ;;  %s300_s13 = scalar_lea.hbm %s450_s0, 512 }
   0x3   :  { %s21_s10 = sshll.u32 %s372_s9, 4  ;;  %p301_p0 = scmp.ne.s32.totalorder %s450_s0, %s300_s13  ;;  %s22_s10 = int_to_ptr.vmem [resolvable:$true] %s21_s10 }
   0x4   :  { %p304_p1 = scmp.lt.u32.totalorder %s300_s13, %s450_s0 }
   0x6   :  { %p306_p2 = pnand %p304_p1, %p301_p0 }
   0x8   :  { %309 = shalt.err (!%p306_p2)
}
   0x9   :  { %s310_s18 = scalar_lea.vmem %s22_s10, 512  ;;  %p315_p4 = scmp.lt.s32.totalorder %s22_s10, %s22_s10 }
   0xa   :  { %p311_p3 = scmp.ne.s32.totalorder %s22_s10, %s310_s18  ;;  %p316_p5 = scmp.lt.s32.totalorder %s310_s18, %s310_s18 }
   0xc   :  { %p317_p6 = por %p316_p5, %p315_p4 }
   0xe   :  { %p318_p7 = pnand %p317_p6, %p311_p3 }
  0x10   :  { %321 = shalt.err (!%p318_p7)
}
  0x11   :  { %s373_s19 = smov 128   ;;  %s374_s20 = smov 8  }
  0x12   :  { %27 = dma.hbm_to_vmem [thread:$0]  %s450_s0, 512, %s22_s10, [#allocation3], %s373_s19, %s373_s19, %s374_s20  }
  0x13   :  { %s375_s23 = smov [#allocation5]   ;;  %s322_s27 = scalar_lea.hbm %s451_s1, 512 }
  0x14   :  { %s39_s24 = sshll.u32 %s375_s23, 4  ;;  %p323_p8 = scmp.ne.s32.totalorder %s451_s1, %s322_s27  ;;  %s40_s24 = int_to_ptr.vmem [resolvable:$true] %s39_s24 }
  0x15   :  { %p326_p9 = scmp.lt.u32.totalorder %s322_s27, %s451_s1 }
  0x17   :  { %p328_p10 = pnand %p326_p9, %p323_p8 }
  0x19   :  { %331 = shalt.err (!%p328_p10)
}
  0x1a   :  { %s332_s4 = scalar_lea.vmem %s40_s24, 512  ;;  %p337_p12 = scmp.lt.s32.totalorder %s40_s24, %s40_s24 }
  0x1b   :  { %p333_p11 = scmp.ne.s32.totalorder %s40_s24, %s332_s4  ;;  %p338_p13 = scmp.lt.s32.totalorder %s332_s4, %s332_s4 }
  0x1d   :  { %p339_p0 = por %p338_p13, %p337_p12 }
  0x1f   :  { %p340_p1 = pnand %p339_p0, %p333_p11 }
  0x21   :  { %343 = shalt.err (!%p340_p1)
}
  0x22   :  { %45 = dma.hbm_to_vmem [thread:$0]  %s451_s1, 512, %s40_s24, [#allocation6], %s373_s19, %s373_s19, %s374_s20  }
  0x23   :  { %366 = dma.done.wait [#allocation3], 512  }
  0x24   :  { %367 = vsyncadd [#allocation3], 4294966784 }
  0x25   :  { %368 = dma.done.wait [#allocation6], 512  }
  0x26   :  { %369 = vsyncadd [#allocation6], 4294966784  ;;  %v65_v0 = vld [vmem:[#allocation2] sm:$0xff]  ;;  %v66_v1 = vld [vmem:[#allocation2 + $0x8] sm:$0xff]  ;;  %s376_s1 = smov [#allocation7]  }
  0x27   :  { %v416_v2 = vld [vmem:[#allocation2 + $0x10] sm:$0xff]  ;;  %v418_v3 = vld [vmem:[#allocation2 + $0x18] sm:$0xff]  ;;  %v93_v4 = vand.u32 2147483647, %v65_v0  ;;  %v94_v5 = vand.u32 2147483647, %v66_v1 }
  0x28   :  { %v95_v6 = vand.u32 2147483647, %v416_v2  ;;  %v96_v7 = vand.u32 2147483647, %v418_v3  ;;  %v69_v26 = vld [vmem:[#allocation5] sm:$0xff]  ;;  %v70_v28 = vld [vmem:[#allocation5 + $0x8] sm:$0xff] }
  0x29   :  { %v97_v8 = vsub.f32 0.0, %v93_v4  ;;  %v98_v9 = vsub.f32 0.0, %v94_v5  ;;  %v71_v29 = vld [vmem:[#allocation5 + $0x10] sm:$0xff]  ;;  %v72_v32 = vld [vmem:[#allocation5 + $0x18] sm:$0xff]  ;;  %v81_v33 = vmax.f32 %v65_v0, 0.0  ;;  %v85_v34 = vmul.f32 %v69_v26, %v65_v0  ;;  %s264_s6 = sshll.u32 %s376_s1, 4  ;;  %s265_s6 = int_to_ptr.vmem [resolvable:$true] %s264_s6 }
  0x2a   :  { %v99_v10 = vsub.f32 0.0, %v95_v6  ;;  %v100_v11 = vsub.f32 0.0, %v96_v7  ;;  %v82_v37 = vmax.f32 %v66_v1, 0.0  ;;  %v86_v38 = vmul.f32 %v70_v28, %v66_v1  ;;  %s344_s7 = scalar_lea.vmem %s265_s6, 128  ;;  %p349_p3 = scmp.lt.s32.totalorder %s265_s6, %s265_s6 }
  0x2b   :  { %v101_v12 = vmul.f32 1.442695, %v97_v8  ;;  %v103_v13 = vmul.f32 1.442695, %v98_v9  ;;  %v83_v41 = vmax.f32 %v416_v2, 0.0  ;;  %v87_v42 = vmul.f32 %v71_v29, %v416_v2  ;;  %p345_p2 = scmp.ne.s32.totalorder %s265_s6, %s344_s7  ;;  %p350_p4 = scmp.lt.s32.totalorder %s344_s7, %s344_s7 }
  0x2c   :  { %v105_v14 = vmul.f32 1.442695, %v99_v10  ;;  %v107_v15 = vmul.f32 1.442695, %v100_v11  ;;  %v84_v44 = vmax.f32 %v418_v3, 0.0  ;;  %v88_v45 = vmul.f32 %v72_v32, %v418_v3 }
  0x2d   :  { %284 = vpow2.f32 %v101_v12  ;;  %v89_v49 = vsub.f32 %v81_v33, %v85_v34  ;;  %v90_v54 = vsub.f32 %v82_v37, %v86_v38  ;;  %v91_v59 = vsub.f32 %v83_v41, %v87_v42  ;;  %p351_p5 = por %p350_p4, %p349_p3 }
  0x2e   :  { %286 = vpow2.f32 %v103_v13  ;;  %v92_v1 = vsub.f32 %v84_v44, %v88_v45 }
  0x2f   :  { %288 = vpow2.f32 %v105_v14  ;;  %p352_p6 = pnand %p351_p5, %p345_p2 }
  0x30   :  { %290 = vpow2.f32 %v107_v15 }
  0x37   :  { %v285_v16 = vpop.eup %284 }
  0x38   :  { %v287_v17 = vpop.eup %286  ;;  %v109_v18 = vadd.f32 1.0, %v285_v16  ;;  %v112_v23 = vmul.f32 -0.5, %v285_v16  ;;  %v115_v35 = vand.u32 2147483647, %v285_v16 }
  0x39   :  { %v289_v19 = vpop.eup %288  ;;  %v118_v20 = vadd.f32 1.0, %v287_v17  ;;  %v121_v24 = vmul.f32 -0.5, %v287_v17  ;;  %v124_v39 = vand.u32 2147483647, %v287_v17 }
  0x3a   :  { %v291_v21 = vpop.eup %290  ;;  %292 = vlog2.f32 %v109_v18  ;;  %v127_v22 = vadd.f32 1.0, %v289_v19  ;;  %v130_v27 = vmul.f32 -0.5, %v289_v19  ;;  %v113_v30 = vadd.f32 1.0, %v112_v23 }
  0x3b   :  { %294 = vlog2.f32 %v118_v20  ;;  %v136_v25 = vadd.f32 1.0, %v291_v21  ;;  %v139_v31 = vmul.f32 -0.5, %v291_v21  ;;  %v122_v36 = vadd.f32 1.0, %v121_v24 }
  0x3c   :  { %296 = vlog2.f32 %v127_v22  ;;  %v131_v40 = vadd.f32 1.0, %v130_v27  ;;  %v133_v43 = vand.u32 2147483647, %v289_v19  ;;  %v114_v46 = vmul.f32 %v285_v16, %v113_v30 }
  0x3d   :  { %298 = vlog2.f32 %v136_v25  ;;  %v140_v47 = vadd.f32 1.0, %v139_v31  ;;  %vm426_vm0 = vcmp.lt.f32.partialorder %v115_v35, 0.0004427343  ;;  %v123_v51 = vmul.f32 %v287_v17, %v122_v36 }
  0x3e   :  { %v142_v52 = vand.u32 2147483647, %v291_v21  ;;  %vm430_vm1 = vcmp.lt.f32.partialorder %v124_v39, 0.0004427343  ;;  %v132_v57 = vmul.f32 %v289_v19, %v131_v40  ;;  %vm134_vm2 = vcmp.lt.f32.partialorder %v133_v43, 0.0004427343 }
  0x3f   :  { %v141_v63 = vmul.f32 %v291_v21, %v140_v47 }
  0x40   :  { %vm143_vm3 = vcmp.lt.f32.partialorder %v142_v52, 0.0004427343 }
  0x44   :  { %v293_v48 = vpop.eup %292 }
  0x45   :  { %v295_v53 = vpop.eup %294  ;;  %v111_v55 = vmul.f32 0.6931472, %v293_v48 }
  0x46   :  { %v297_v58 = vpop.eup %296  ;;  %v120_v60 = vmul.f32 0.6931472, %v295_v53 }
  0x47   :  { %v117_v61 = vsel %vm426_vm0, %v114_v46, %v111_v55  ;;  %v129_v62 = vmul.f32 0.6931472, %v297_v58  ;;  %v299_v0 = vpop.eup %298 }
  0x48   :  { %v126_v2 = vsel %vm430_vm1, %v123_v51, %v120_v60  ;;  %v145_v3 = vadd.f32 %v117_v61, %v89_v49  ;;  %v138_v5 = vmul.f32 0.6931472, %v299_v0 }
  0x49   :  { %v135_v4 = vsel %vm134_vm2, %v132_v57, %v129_v62  ;;  %v146_v6 = vadd.f32 %v126_v2, %v90_v54 }
  0x4a   :  { %v147_v7 = vadd.f32 %v135_v4, %v91_v59  ;;  %v144_v8 = vsel %vm143_vm3, %v141_v63, %v138_v5 }
  0x4b   :  { %v150_v9 = vadd.f32 %v146_v6, %v145_v3  ;;  %v148_v10 = vadd.f32 %v144_v8, %v92_v1 }
  0x4d   :  { %v151_v11 = vadd.f32 %v150_v9, %v147_v7 }
  0x4f   :  { %v152_v12 = vadd.f32 %v151_v11, %v148_v10 }
  0x51   :  { %154 = vst [vmem:[#allocation7] sm:$0xff] %v152_v12 }
  0x52   :  { %355 = shalt.err (!%p352_p6)
}
  0x53   :  { %s356_s10 = scalar_lea.hbm %s452_s2, 128 }
  0x54   :  { %p357_p7 = scmp.ne.s32.totalorder %s452_s2, %s356_s10  ;;  %p360_p8 = scmp.lt.u32.totalorder %s356_s10, %s452_s2 }
  0x56   :  { %p362_p9 = pnand %p360_p8, %p357_p7 }
  0x58   :  { %365 = shalt.err (!%p362_p9)
}
  0x59   :  { %267 = dma.vmem_to_hbm [thread:$0]  %s265_s6, 128, %s452_s2, [#allocation4]  }
  0x5a   :  { %370 = dma.done.wait [#allocation4], 128  }
  0x5b   :  { %371 = vsyncadd [#allocation4], 4294967168 }
  0x5c   :  { %271 = vsyncpa [#allocation3], 1 }
  0x5d   :  { %272 = vsyncpa [#allocation6], 1 }
  0x5e   :  { %273 = vsyncpa [#allocation4], 1 }

</bundles_post_ra>
